<compile_context>
chip_gen: v7x
topology: tpu7x:2x2x1
jax: 0.10.0
libtpu: 0.0.40
codegen_flags: <defaults>
</compile_context>

<pallas_src>
import functools

import jax
import jax.numpy as jnp
from jax import lax
from jax.experimental import pallas as pl
from jax.experimental.pallas import tpu as pltpu


TOTAL_BIAS = 0.51465023748498  # module attribute, unused in returned values


def _round_up(x, m):
    return (x + m - 1) // m * m


# ---------------------------------------------------------------------------
# Kernel 1: per-example dot product + sigmoid, lane-dense output.
# ---------------------------------------------------------------------------
def _dot_sigmoid_kernel(u_ref, m_ref, sig_ref):
    # u_ref, m_ref: (TILE_B, k); sig_ref: (1, TILE_B)  (batch on lanes).
    dot = jnp.sum(u_ref[...] * m_ref[...], axis=-1)          # (TILE_B,)
    sig_ref[...] = jax.nn.sigmoid(dot)[None, :]               # lane-dense store


def _dot_sigmoid(u_feat, m_feat):
    B, k = u_feat.shape
    # Single full-size block for small B; 256-row tiles (8- and 128-aligned)
    # once B is production-sized.
    tile_b = _round_up(B, 8) if B <= 256 else 256
    n_tiles = pl.cdiv(B, tile_b)

    out = pl.pallas_call(
        _dot_sigmoid_kernel,
        out_shape=jax.ShapeDtypeStruct((1, n_tiles * tile_b), jnp.float32),
        grid_spec=pltpu.PrefetchScalarGridSpec(
            num_scalar_prefetch=0,
            grid=(n_tiles,),
            in_specs=[
                pl.BlockSpec((tile_b, k), lambda i: (i, 0)),
                pl.BlockSpec((tile_b, k), lambda i: (i, 0)),
            ],
            out_specs=pl.BlockSpec((1, tile_b), lambda i: (0, i)),
        ),
        compiler_params=pltpu.CompilerParams(
            dimension_semantics=("parallel",)),
    )(u_feat, m_feat)
    # Drop any tail padding (padded rows produce garbage that is sliced away).
    return out.reshape(-1)[:B]


# ---------------------------------------------------------------------------
# Kernel 2: tiled L1 (sum of |w|) over one embedding table.
# ---------------------------------------------------------------------------
def _l1_partial_kernel(tab_ref, out_ref, acc_ref, *, rows, tiles_per_core):
    t = pl.program_id(1)

    @pl.when(t == 0)
    def _init():
        acc_ref[...] = jnp.zeros_like(acc_ref)

    tile_rows = tab_ref.shape[0]
    tile_idx = pl.program_id(0) * tiles_per_core + t          # unclamped index
    row_ids = tile_idx * tile_rows + lax.broadcasted_iota(
        jnp.int32, tab_ref.shape, 0)
    # Mask padded / out-of-range rows (partial last tile, empty trailing tiles
    # of the parallel split) so they contribute 0 to the L1 sum.
    vals = jnp.where(row_ids < rows, jnp.abs(tab_ref[...]), 0.0)
    acc_ref[...] += jnp.sum(vals, keepdims=True)              # (1, 1) f32

    @pl.when(t == pl.num_programs(1) - 1)
    def _finalize():
        # One aligned (8, 128) block per parallel core; partial is broadcast.
        out_ref[...] = jnp.broadcast_to(acc_ref[...], out_ref.shape)


_L1_TILE_BYTES = 4 * 1024 * 1024   # per input buffer; x2 double-buffered stays
                                   # well under scoped-VMEM defaults on all chips
_L1_PARALLEL_CORES = 2             # v7x megacore split; serial loop elsewhere


def _table_l1(tab):
    rows, k = tab.shape
    tile_rows = max(8, min(8192, (_L1_TILE_BYTES // (4 * k)) // 8 * 8))
    tile_rows = min(tile_rows, _round_up(rows, 8))
    total_tiles = pl.cdiv(rows, tile_rows)
    tiles_per_core = pl.cdiv(total_tiles, _L1_PARALLEL_CORES)

    def tab_index(p, t):
        # Clamp so a core's trailing (empty) tiles never issue a fully
        # out-of-bounds DMA; the in-kernel row mask zeroes their contribution.
        return (jnp.minimum(p * tiles_per_core + t, total_tiles - 1), 0)

    kernel = functools.partial(
        _l1_partial_kernel, rows=rows, tiles_per_core=tiles_per_core)

    partials = pl.pallas_call(
        kernel,
        out_shape=jax.ShapeDtypeStruct((_L1_PARALLEL_CORES * 8, 128),
                                       jnp.float32),
        grid_spec=pltpu.PrefetchScalarGridSpec(
            num_scalar_prefetch=0,
            grid=(_L1_PARALLEL_CORES, tiles_per_core),
            in_specs=[pl.BlockSpec((tile_rows, k), tab_index)],
            out_specs=pl.BlockSpec((8, 128), lambda p, t: (p, 0)),
            scratch_shapes=[pltpu.VMEM((1, 1), jnp.float32)],
        ),
        compiler_params=pltpu.CompilerParams(
            dimension_semantics=("parallel", "arbitrary")),
    )(tab)
    # Each core's partial sum is broadcast across its own (8, 128) block.
    return jnp.sum(partials.reshape(_L1_PARALLEL_CORES, 8, 128)[:, 0, 0])


# ---------------------------------------------------------------------------
# Forward wrapper (matches DualEmbedding.forward).
# ---------------------------------------------------------------------------
def dual_embedding_forward(user, movie, params):
    """Returns (sigmoid(dot_product), l1_loss), like the torch module."""
    user_tab = params["user_embed"]       # (user_n, k)
    movie_tab = params["movie_embed"]     # (movie_n, k)
    # user_bias / movie_bias only feed the discarded `result` in the torch
    # module, so they are not gathered or touched at all (dead-code removal).

    user_flat = user.reshape(-1)
    movie_flat = movie.reshape(-1)

    # Embedding lookups (XLA glue).
    # TODO(synk): fuse the gather into the kernel via scalar prefetch / manual
    # per-row DMA for large tables and batches.
    u_feat = jnp.take(user_tab, user_flat, axis=0)     # (B, k)
    m_feat = jnp.take(movie_tab, movie_flat, axis=0)   # (B, k)

    sig = _dot_sigmoid(u_feat, m_feat)                 # (B,)
    l1 = _table_l1(user_tab) + _table_l1(movie_tab)    # scalar

    return sig.reshape(user.shape), l1


def init_params(key, user_n, movie_n, k):
    # nn.Embedding default init: weights ~ N(0, 1).  Bias tables are kept for
    # module fidelity even though they do not affect the returned values.
    k0, k1, k2, k3 = jax.random.split(key, 4)
    return {
        "user_embed": jax.random.normal(k0, (user_n, k), jnp.float32),
        "user_bias": jax.random.normal(k1, (user_n, 1), jnp.float32),
        "movie_embed": jax.random.normal(k2, (movie_n, k), jnp.float32),
        "movie_bias": jax.random.normal(k3, (movie_n, 1), jnp.float32),
    }


def _reference_forward(user, movie, params):
    u_feat = params["user_embed"][user]
    m_feat = params["movie_embed"][movie]
    dot = jnp.sum(u_feat * m_feat, axis=-1)
    l1 = jnp.sum(jnp.abs(params["user_embed"])) + jnp.sum(jnp.abs(params["movie_embed"]))
    return jax.nn.sigmoid(dot), l1


if __name__ == "__main__":
    user_n, movie_n, k = 64, 48, 32
    B = 8

    key = jax.random.PRNGKey(0)
    pkey, ukey, mkey = jax.random.split(key, 3)
    params = init_params(pkey, user_n, movie_n, k)

    user = jax.random.randint(ukey, (B,), 0, user_n, dtype=jnp.int32)
    movie = jax.random.randint(mkey, (B,), 0, movie_n, dtype=jnp.int32)

    sig, l1 = dual_embedding_forward(user, movie, params)
    jax.block_until_ready((sig, l1))

    ref_sig, ref_l1 = _reference_forward(user, movie, params)
    assert sig.shape == user.shape
    assert jnp.allclose(sig, ref_sig, atol=1e-5, rtol=1e-5)
    # Tiled f32 partial-sum accumulation can drift slightly vs one big sum.
    assert jnp.allclose(l1, ref_l1, atol=1e-2, rtol=1e-4)

    print("KERNEL_OK")
</pallas_src>

<mosaic_0001>
module attributes {stable_mosaic.version = 11 : i64} {
  func.func @_dot_sigmoid_kernel(%arg0: i32, %arg1: memref<8x32xf32, #tpu.memory_space<vmem>>, %arg2: memref<8x32xf32, #tpu.memory_space<vmem>>, %arg3: memref<1x8xf32, #tpu.memory_space<vmem>>) attributes {dimension_semantics = [#tpu.dimension_semantics<parallel>], iteration_bounds = array<i64: 1>, scalar_prefetch = 0 : i64, scratch_operands = 0 : i64, tpu.core_type = #tpu.core_type<tc>, window_params = [{transform_indices = @transform_0, window_bounds = array<i64: 8, 32>}, {transform_indices = @transform_1, window_bounds = array<i64: 8, 32>}, {transform_indices = @transform_2, window_bounds = array<i64: 1, 8>}]} {
    %c0 = arith.constant 0 : index
    %c0_0 = arith.constant 0 : index
    %0 = vector.load %arg1[%c0, %c0_0] : memref<8x32xf32, #tpu.memory_space<vmem>>, vector<8x32xf32>
    %c0_1 = arith.constant 0 : index
    %c0_2 = arith.constant 0 : index
    %1 = vector.load %arg2[%c0_1, %c0_2] : memref<8x32xf32, #tpu.memory_space<vmem>>, vector<8x32xf32>
    %2 = arith.mulf %0, %1 : vector<8x32xf32>
    %cst = arith.constant dense<0.000000e+00> : vector<8xf32>
    %3 = vector.multi_reduction <add>, %2, %cst [1] : vector<8x32xf32> to vector<8xf32>
    %4 = arith.negf %3 : vector<8xf32>
    %5 = math.exp %4 : vector<8xf32>
    %cst_3 = arith.constant 1.000000e+00 : f32
    %6 = vector.broadcast %cst_3 : f32 to vector<8xf32>
    %7 = arith.addf %6, %5 : vector<8xf32>
    %8 = arith.divf %6, %7 : vector<8xf32>
    %9 = vector.shape_cast %8 : vector<8xf32> to vector<1x8xf32>
    %c0_4 = arith.constant 0 : index
    %c0_5 = arith.constant 0 : index
    %10 = vector.load %arg3[%c0_4, %c0_5] : memref<1x8xf32, #tpu.memory_space<vmem>>, vector<1x8xf32>
    tpu.vector_store %arg3[%c0_4, %c0_5], %9 {strides = array<i32>} : memref<1x8xf32, #tpu.memory_space<vmem>>, vector<1x8xf32>,
    return
  }
  func.func @transform_0(%arg0: i32) -> (i32, i32) {
    %c0_i32 = arith.constant 0 : i32
    %c0_i32_0 = arith.constant 0 : i32
    return %arg0, %c0_i32 : i32, i32
  }
  func.func @transform_1(%arg0: i32) -> (i32, i32) {
    %c0_i32 = arith.constant 0 : i32
    %c0_i32_0 = arith.constant 0 : i32
    return %arg0, %c0_i32 : i32, i32
  }
  func.func @transform_2(%arg0: i32) -> (i32, i32) {
    %c0_i32 = arith.constant 0 : i32
    %c0_i32_0 = arith.constant 0 : i32
    return %c0_i32, %arg0 : i32, i32
  }
}

</mosaic_0001>

<bundles_post_ra>
// kernel: tpu_custom_call.1
= control target key start
LH: loop header
LB: loop body
LE: loop exit
PB: predicated region body
PF: predicated region fallthrough
CT: control target
= control target key end

     0   :  { %7 = vsyncpa [#allocation3], 0  ;;  %s209_s0 = inlined_call_operand.hbm [shape: f32[8,32], index: 0, kind: input, shape index: {}]   ;;  %s210_s1 = inlined_call_operand.hbm [shape: f32[8,32], index: 1, kind: input, shape index: {}]   ;;  %s211_s2 = inlined_call_operand.hbm [shape: f32[1,8], index: 2, kind: output, shape index: {}]  }
   0x1   :  { %8 = vsyncpa [#allocation6], 0 }
   0x2   :  { %9 = vsyncpa [#allocation4], 0  ;;  %s155_s9 = smov [#allocation2]   ;;  %s156_s11 = smov [#allocation5]  }
   0x3   :  { %s16_s10 = sshll.u32 %s155_s9, 4  ;;  %s26_s12 = sshll.u32 %s156_s11, 4  ;;  %s17_s10 = int_to_ptr.vmem [resolvable:$true] %s16_s10  ;;  %s27_s12 = int_to_ptr.vmem [resolvable:$true] %s26_s12 }
   0x4   :  { %s83_s15 = scalar_lea.hbm %s209_s0, 128 }
   0x5   :  { %p84_p0 = scmp.ne.s32.totalorder %s209_s0, %s83_s15  ;;  %p87_p1 = scmp.lt.u32.totalorder %s83_s15, %s209_s0 }
   0x7   :  { %p89_p2 = pnand %p87_p1, %p84_p0 }
   0x9   :  { %92 = shalt.err (!%p89_p2)
}
   0xa   :  { %s93_s20 = scalar_lea.vmem %s17_s10, 128  ;;  %p98_p4 = scmp.lt.s32.totalorder %s17_s10, %s17_s10 }
   0xb   :  { %p94_p3 = scmp.ne.s32.totalorder %s17_s10, %s93_s20  ;;  %p99_p5 = scmp.lt.s32.totalorder %s93_s20, %s93_s20 }
   0xd   :  { %p100_p6 = por %p99_p5, %p98_p4 }
   0xf   :  { %p101_p7 = pnand %p100_p6, %p94_p3 }
  0x11   :  { %104 = shalt.err (!%p101_p7)
}
  0x12   :  { %19 = dma.hbm_to_vmem [thread:$0]  %s209_s0, 128, %s17_s10, [#allocation3]  }
  0x13   :  { %s105_s25 = scalar_lea.hbm %s210_s1, 128 }
  0x14   :  { %p106_p8 = scmp.ne.s32.totalorder %s210_s1, %s105_s25  ;;  %p109_p9 = scmp.lt.u32.totalorder %s105_s25, %s210_s1 }
  0x16   :  { %p111_p10 = pnand %p109_p9, %p106_p8 }
  0x18   :  { %114 = shalt.err (!%p111_p10)
}
  0x19   :  { %s115_s30 = scalar_lea.vmem %s27_s12, 128  ;;  %p120_p12 = scmp.lt.s32.totalorder %s27_s12, %s27_s12 }
  0x1a   :  { %p116_p11 = scmp.ne.s32.totalorder %s27_s12, %s115_s30  ;;  %p121_p13 = scmp.lt.s32.totalorder %s115_s30, %s115_s30 }
  0x1c   :  { %p122_p0 = por %p121_p13, %p120_p12 }
  0x1e   :  { %p123_p1 = pnand %p122_p0, %p116_p11 }
  0x20   :  { %126 = shalt.err (!%p123_p1)
}
  0x21   :  { %29 = dma.hbm_to_vmem [thread:$0]  %s210_s1, 128, %s27_s12, [#allocation6]  }
  0x22   :  { %149 = dma.done.wait [#allocation3], 128  }
  0x23   :  { %150 = vsyncadd [#allocation3], 4294967168 }
  0x24   :  { %151 = dma.done.wait [#allocation6], 128  }
  0x25   :  { %152 = vsyncadd [#allocation6], 4294967168  ;;  %v36_v0 = vld [vmem:[#allocation2] sm:$0xff]  ;;  %v37_v1 = vld [vmem:[#allocation5] sm:$0xff]  ;;  %vm39_vm0 = vcmask 261120   ;;  %v50_v8 = vlaneseq  ;;  %s157_s1 = smov [#allocation7]  }
  0x26   :  { %v38_v2 = vmul.f32 %v37_v1, %v36_v0  ;;  %s65_s4 = sshll.u32 %s157_s1, 4  ;;  %vm57_vm1 = vcmask 57344   ;;  %s66_s4 = int_to_ptr.vmem [resolvable:$true] %s65_s4 }
  0x27   :  { %v51_v9 = vand.u32 127, %v50_v8  ;;  %v53_v10 = vshrl.u32 %v50_v8, 7  ;;  %s127_s5 = scalar_lea.vmem %s66_s4, 16  ;;  %s131_s6 = scalar_lea.vmem %s66_s4, 32 }
  0x28   :  { %v40_v3 = vsel %vm39_vm0, %v38_v2, 0.0  ;;  %p128_p2 = scmp.ne.s32.totalorder %s66_s4, %s127_s5  ;;  %p132_p3 = scmp.lt.s32.totalorder %s66_s4, %s66_s4 }
  0x29   :  { %41 = vadd.xlane.f32.xlu0 %v40_v3  ;;  %v54_v11 = vsub.s32 %v51_v9, %v53_v10  ;;  %p133_p4 = scmp.lt.s32.totalorder %s131_s6, %s127_s5 }
  0x2b   :  { %p134_p5 = por %p133_p4, %p132_p3 }
  0x2d   :  { %p135_p6 = pnand %p134_p5, %p128_p2 }
  0xb6   :  { %v42_v4 = vpop.xlane.xlu0 %41 }
  0xb7   :  { %v75_v5 = vmul.f32 -1.442695, %v42_v4 }
  0xb9   :  { %79 = vpow2.f32 %v75_v5 }
  0xc3   :  { %v80_v6 = vpop.eup %79 }
  0xc4   :  { %v46_v7 = vadd.f32 1.0, %v80_v6 }
  0xc6   :  { %81 = vrcp.f32 %v46_v7 }
  0xd0   :  { %v82_v12 = vpop.eup %81 }
  0xd1   :  { %v55_v13 = vrot.slane %v82_v12, %v54_v11 }
  0xd3   :  { %58 = vst.msk [vmem:[#allocation7] sm:$0x1] %vm57_vm1, %v55_v13 }
  0xd4   :  { %138 = shalt.err (!%p135_p6)
}
  0xd5   :  { %s139_s9 = scalar_lea.hbm %s211_s2, 16 }
  0xd6   :  { %p140_p7 = scmp.ne.s32.totalorder %s211_s2, %s139_s9  ;;  %p143_p8 = scmp.lt.u32.totalorder %s139_s9, %s211_s2 }
  0xd8   :  { %p145_p9 = pnand %p143_p8, %p140_p7 }
  0xda   :  { %148 = shalt.err (!%p145_p9)
}
  0xdb   :  { %68 = dma.vmem_to_hbm [thread:$0]  %s66_s4, 16, %s211_s2, [#allocation4]  }
  0xdc   :  { %153 = dma.done.wait [#allocation4], 16  }
  0xdd   :  { %154 = vsyncadd [#allocation4], 4294967280 }
  0xde   :  { %72 = vsyncpa [#allocation3], 1 }
  0xdf   :  { %73 = vsyncpa [#allocation6], 1 }
  0xe0   :  { %74 = vsyncpa [#allocation4], 1 }

</bundles_post_ra>
